<compile_context>
chip_gen: v7x
topology: tpu7x:2x2x1
jax: 0.10.0
libtpu: 0.0.40
codegen_flags: <defaults>
</compile_context>

<pallas_src>
import jax
import jax.numpy as jnp
from jax.experimental import pallas as pl
from jax.experimental.pallas import tpu as pltpu


_LANE = 128
_MAX_R_TILE = 512   # (8, 512, 128) f32 block = 2 MiB (4 MiB double-buffered)
# Identity pad box: pred == gt == [0, 0, 1, 1] -> loss contribution exactly 0.
_PAD_COL = (0.0, 0.0, 1.0, 1.0, 0.0, 0.0, 1.0, 1.0)


def _round_up(x, m):
    return ((x + m - 1) // m) * m


def _iou_loss_kernel(boxes_ref, out_ref, acc_ref):
    # boxes_ref : (8, R_TILE, 128) VMEM; planes = [px,py,pw,ph,gx,gy,gw,gh]
    # out_ref   : (1, 1) f32 SMEM block (one partial sum per parallel chunk)
    # acc_ref   : (R_TILE, 128) f32 VMEM scratch, dense lane/sublane accumulator
    t = pl.program_id(1)

    @pl.when(t == 0)
    def _init():
        acc_ref[...] = jnp.zeros_like(acc_ref)

    px = boxes_ref[0].astype(jnp.float32)
    py = boxes_ref[1].astype(jnp.float32)
    pw = boxes_ref[2].astype(jnp.float32)
    ph = boxes_ref[3].astype(jnp.float32)
    gx = boxes_ref[4].astype(jnp.float32)
    gy = boxes_ref[5].astype(jnp.float32)
    gw = boxes_ref[6].astype(jnp.float32)
    gh = boxes_ref[7].astype(jnp.float32)

    pw_h = pw * 0.5
    ph_h = ph * 0.5
    gw_h = gw * 0.5
    gh_h = gh * 0.5

    tl_x = jnp.maximum(px - pw_h, gx - gw_h)
    tl_y = jnp.maximum(py - ph_h, gy - gh_h)
    br_x = jnp.minimum(px + pw_h, gx + gw_h)
    br_y = jnp.minimum(py + ph_h, gy + gh_h)

    area_p = pw * ph
    area_g = gw * gh

    en = jnp.logical_and(tl_x < br_x, tl_y < br_y).astype(jnp.float32)
    area_i = (br_x - tl_x) * (br_y - tl_y) * en
    area_u = area_p + area_g - area_i
    # EUP divide; approx=False keeps full f32 accuracy (and makes the identity
    # pad boxes contribute exactly 0, so no tail mask / correction is needed).
    iou = area_i * pl.reciprocal(area_u + 1e-16, approx=False)
    loss = 1.0 - iou * iou                       # (R_TILE, 128), fully dense

    acc_ref[...] += loss                         # dense VPU add

    @pl.when(t == pl.num_programs(1) - 1)
    def _finalize():
        out_ref[0, 0] = jnp.sum(acc_ref[...])    # single cross-lane reduce


def _iou_loss_partials(packed, num_chunks, tiles_per_chunk, r_tile):
    # packed: (8, num_chunks * tiles_per_chunk * r_tile, 128)
    grid_spec = pltpu.PrefetchScalarGridSpec(
        num_scalar_prefetch=0,
        grid=(num_chunks, tiles_per_chunk),
        in_specs=[pl.BlockSpec(
            (8, r_tile, _LANE),
            lambda c, t: (0, c * tiles_per_chunk + t, 0))],
        out_specs=pl.BlockSpec((1, 1), lambda c, t: (c, 0),
                               memory_space=pltpu.MemorySpace.SMEM),
        scratch_shapes=[pltpu.VMEM((r_tile, _LANE), jnp.float32)],
    )
    return pl.pallas_call(
        _iou_loss_kernel,
        out_shape=jax.ShapeDtypeStruct((num_chunks, 1), jnp.float32),
        grid_spec=grid_spec,
        compiler_params=pltpu.CompilerParams(
            # Chunk axis feeds both v7x TensorCores; tile axis is the
            # sequential accumulation axis.
            dimension_semantics=("parallel", "arbitrary"),
            vmem_limit_bytes=32 * 1024 * 1024,
        ),
    )(packed)


def iou_loss_forward(pred, gt, max_r_tile=_MAX_R_TILE):
    """pred, gt: (N, 4) xywh.  Returns (loss, loss, zeros_like(loss))."""
    pred = pred.reshape(-1, 4)
    gt = gt.reshape(-1, 4)
    n = pred.shape[0]

    # Tiling: box i lives at plane[:, i // 128, i % 128].
    r_needed = pl.cdiv(max(n, 1), _LANE)
    r_tile = min(max_r_tile, _round_up(r_needed, 8))
    total_tiles = pl.cdiv(r_needed, r_tile)
    num_chunks = 2 if total_tiles >= 2 else 1
    tiles_per_chunk = pl.cdiv(total_tiles, num_chunks)
    r_pad = num_chunks * tiles_per_chunk * r_tile
    n_pad = r_pad * _LANE

    # Single fused pack to component-major planes.  Padded slots get the
    # identity box [0,0,1,1] for BOTH pred and gt -> exactly zero loss.
    comp = jnp.concatenate([pred, gt], axis=1).T                    # (8, N)
    if n_pad != n:
        pad_col = jnp.asarray(_PAD_COL, dtype=comp.dtype)[:, None]
        comp = jnp.concatenate(
            [comp, jnp.broadcast_to(pad_col, (8, n_pad - n))], axis=1)
    packed = comp.reshape(8, r_pad, _LANE)

    partials = _iou_loss_partials(packed, num_chunks, tiles_per_chunk, r_tile)
    loss = jnp.sum(partials)
    return (loss, loss, jnp.zeros_like(loss))


def _reference(pred, gt):
    # Pure-JAX reference of YOLOX IOUloss (loss_type='iou', reduction='sum').
    pred = pred.astype(jnp.float32)
    gt = gt.astype(jnp.float32)
    tl = jnp.maximum(pred[:, :2] - pred[:, 2:] / 2, gt[:, :2] - gt[:, 2:] / 2)
    br = jnp.minimum(pred[:, :2] + pred[:, 2:] / 2, gt[:, :2] + gt[:, 2:] / 2)
    area_p = jnp.prod(pred[:, 2:], axis=1)
    area_g = jnp.prod(gt[:, 2:], axis=1)
    en = jnp.prod((tl < br).astype(jnp.float32), axis=1)
    area_i = jnp.prod(br - tl, axis=1) * en
    iou = area_i / (area_p + area_g - area_i + 1e-16)
    return jnp.sum(1.0 - iou ** 2)


def _make_boxes(key, n):
    k1, k2, k3, k4 = jax.random.split(key, 4)
    pred_xy = jax.random.uniform(k1, (n, 2), jnp.float32) * 16.0
    pred_wh = jax.random.uniform(k2, (n, 2), jnp.float32) * 8.0 + 1.0
    gt_xy = pred_xy + jax.random.normal(k3, (n, 2), jnp.float32)
    gt_wh = jnp.abs(pred_wh * (1.0 + 0.2 * jax.random.normal(k4, (n, 2),
                                                             jnp.float32))) + 1e-3
    pred = jnp.concatenate([pred_xy, pred_wh], axis=1)       # (n, 4) xywh
    gt = jnp.concatenate([gt_xy, gt_wh], axis=1)
    return pred, gt


if __name__ == "__main__":
    key = jax.random.PRNGKey(0)
    k_a, k_b, k_c = jax.random.split(key, 3)

    # Case 1: small N (8 boxes) -> single (8, 8, 128) tile; identity-pad path.
    pred, gt = _make_boxes(k_a, 8)
    loss1, loss2, zero = iou_loss_forward(pred, gt)
    jax.block_until_ready((loss1, loss2, zero))
    ref = _reference(pred, gt)
    assert jnp.allclose(loss1, ref, rtol=1e-5, atol=1e-5), (loss1, ref)
    assert jnp.allclose(loss2, ref, rtol=1e-5, atol=1e-5)
    assert zero == 0.0

    # Case 2: N=3000 with r_tile forced to 8 (1024 boxes/tile) -> 3 real tiles
    # padded to 2 chunks x 2 tiles: exercises the parallel-chunk partials, the
    # accumulation along the arbitrary axis, and a fully identity-padded tile.
    pred_b, gt_b = _make_boxes(k_b, 3000)
    loss_b, _, _ = iou_loss_forward(pred_b, gt_b, max_r_tile=8)
    jax.block_until_ready(loss_b)
    ref_b = _reference(pred_b, gt_b)
    assert jnp.allclose(loss_b, ref_b, rtol=1e-5, atol=1e-5), (loss_b, ref_b)

    # Case 3: N=80000 with the default tile -> full-size 2 MiB blocks,
    # 2 chunks x 1 tile; validates VMEM footprint of the production config.
    pred_c, gt_c = _make_boxes(k_c, 80000)
    loss_c, _, _ = iou_loss_forward(pred_c, gt_c)
    jax.block_until_ready(loss_c)
    ref_c = _reference(pred_c, gt_c)
    assert jnp.allclose(loss_c, ref_c, rtol=1e-5, atol=1e-5), (loss_c, ref_c)

    print("KERNEL_OK")
</pallas_src>

<mosaic_0001>
module attributes {stable_mosaic.version = 11 : i64} {
  func.func @_iou_loss_kernel(%arg0: i32, %arg1: i32, %arg2: memref<8x8x128xf32, #tpu.memory_space<vmem>>, %arg3: memref<1x1xf32, #tpu.memory_space<smem>>, %arg4: memref<8x128xf32, #tpu.memory_space<vmem>>) attributes {dimension_semantics = [#tpu.dimension_semantics<parallel>, #tpu.dimension_semantics<arbitrary>], iteration_bounds = array<i64: 1, 1>, scalar_prefetch = 0 : i64, scratch_operands = 1 : i64, tpu.core_type = #tpu.core_type<tc>, window_params = [{transform_indices = @transform_0, window_bounds = array<i64: 8, 8, 128>}, {transform_indices = @transform_1, window_bounds = array<i64: 1, 1>}]} {
    %c0_i32 = arith.constant 0 : i32
    %0 = arith.cmpi eq, %arg1, %c0_i32 : i32
    %1 = arith.extui %0 : i1 to i32
    %c0_i32_0 = arith.constant 0 : i32
    %2 = arith.cmpi ne, %1, %c0_i32_0 : i32
    scf.if %2 {
      %cst_28 = arith.constant 0.000000e+00 : f32
      %65 = vector.broadcast %cst_28 : f32 to vector<8x128xf32>
      %c0_29 = arith.constant 0 : index
      %c0_30 = arith.constant 0 : index
      %66 = vector.load %arg4[%c0_29, %c0_30] : memref<8x128xf32, #tpu.memory_space<vmem>>, vector<8x128xf32>
      tpu.vector_store %arg4[%c0_29, %c0_30], %65 {strides = array<i32>} : memref<8x128xf32, #tpu.memory_space<vmem>>, vector<8x128xf32>,
    } else {
    }
    %c0 = arith.constant 0 : index
    %c0_1 = arith.constant 0 : index
    %c0_2 = arith.constant 0 : index
    %3 = vector.load %arg2[%c0, %c0_1, %c0_2] : memref<8x8x128xf32, #tpu.memory_space<vmem>>, vector<1x8x128xf32>
    %4 = vector.shape_cast %3 : vector<1x8x128xf32> to vector<8x128xf32>
    %c1 = arith.constant 1 : index
    %c0_3 = arith.constant 0 : index
    %c0_4 = arith.constant 0 : index
    %5 = vector.load %arg2[%c1, %c0_3, %c0_4] : memref<8x8x128xf32, #tpu.memory_space<vmem>>, vector<1x8x128xf32>
    %6 = vector.shape_cast %5 : vector<1x8x128xf32> to vector<8x128xf32>
    %c2 = arith.constant 2 : index
    %c0_5 = arith.constant 0 : index
    %c0_6 = arith.constant 0 : index
    %7 = vector.load %arg2[%c2, %c0_5, %c0_6] : memref<8x8x128xf32, #tpu.memory_space<vmem>>, vector<1x8x128xf32>
    %8 = vector.shape_cast %7 : vector<1x8x128xf32> to vector<8x128xf32>
    %c3 = arith.constant 3 : index
    %c0_7 = arith.constant 0 : index
    %c0_8 = arith.constant 0 : index
    %9 = vector.load %arg2[%c3, %c0_7, %c0_8] : memref<8x8x128xf32, #tpu.memory_space<vmem>>, vector<1x8x128xf32>
    %10 = vector.shape_cast %9 : vector<1x8x128xf32> to vector<8x128xf32>
    %c4 = arith.constant 4 : index
    %c0_9 = arith.constant 0 : index
    %c0_10 = arith.constant 0 : index
    %11 = vector.load %arg2[%c4, %c0_9, %c0_10] : memref<8x8x128xf32, #tpu.memory_space<vmem>>, vector<1x8x128xf32>
    %12 = vector.shape_cast %11 : vector<1x8x128xf32> to vector<8x128xf32>
    %c5 = arith.constant 5 : index
    %c0_11 = arith.constant 0 : index
    %c0_12 = arith.constant 0 : index
    %13 = vector.load %arg2[%c5, %c0_11, %c0_12] : memref<8x8x128xf32, #tpu.memory_space<vmem>>, vector<1x8x128xf32>
    %14 = vector.shape_cast %13 : vector<1x8x128xf32> to vector<8x128xf32>
    %c6 = arith.constant 6 : index
    %c0_13 = arith.constant 0 : index
    %c0_14 = arith.constant 0 : index
    %15 = vector.load %arg2[%c6, %c0_13, %c0_14] : memref<8x8x128xf32, #tpu.memory_space<vmem>>, vector<1x8x128xf32>
    %16 = vector.shape_cast %15 : vector<1x8x128xf32> to vector<8x128xf32>
    %c7 = arith.constant 7 : index
    %c0_15 = arith.constant 0 : index
    %c0_16 = arith.constant 0 : index
    %17 = vector.load %arg2[%c7, %c0_15, %c0_16] : memref<8x8x128xf32, #tpu.memory_space<vmem>>, vector<1x8x128xf32>
    %18 = vector.shape_cast %17 : vector<1x8x128xf32> to vector<8x128xf32>
    %cst = arith.constant 5.000000e-01 : f32
    %19 = vector.broadcast %cst : f32 to vector<8x128xf32>
    %20 = arith.mulf %8, %19 : vector<8x128xf32>
    %cst_17 = arith.constant 5.000000e-01 : f32
    %21 = vector.broadcast %cst_17 : f32 to vector<8x128xf32>
    %22 = arith.mulf %10, %21 : vector<8x128xf32>
    %cst_18 = arith.constant 5.000000e-01 : f32
    %23 = vector.broadcast %cst_18 : f32 to vector<8x128xf32>
    %24 = arith.mulf %16, %23 : vector<8x128xf32>
    %cst_19 = arith.constant 5.000000e-01 : f32
    %25 = vector.broadcast %cst_19 : f32 to vector<8x128xf32>
    %26 = arith.mulf %18, %25 : vector<8x128xf32>
    %27 = arith.subf %4, %20 : vector<8x128xf32>
    %28 = arith.subf %12, %24 : vector<8x128xf32>
    %29 = arith.maximumf %27, %28 : vector<8x128xf32>
    %30 = arith.subf %6, %22 : vector<8x128xf32>
    %31 = arith.subf %14, %26 : vector<8x128xf32>
    %32 = arith.maximumf %30, %31 : vector<8x128xf32>
    %33 = arith.addf %4, %20 : vector<8x128xf32>
    %34 = arith.addf %12, %24 : vector<8x128xf32>
    %35 = arith.minimumf %33, %34 : vector<8x128xf32>
    %36 = arith.addf %6, %22 : vector<8x128xf32>
    %37 = arith.addf %14, %26 : vector<8x128xf32>
    %38 = arith.minimumf %36, %37 : vector<8x128xf32>
    %39 = arith.mulf %8, %10 : vector<8x128xf32>
    %40 = arith.mulf %16, %18 : vector<8x128xf32>
    %41 = arith.cmpf olt, %29, %35 : vector<8x128xf32>
    %42 = arith.cmpf olt, %32, %38 : vector<8x128xf32>
    %43 = arith.andi %41, %42 : vector<8x128xi1>
    %44 = arith.extui %43 : vector<8x128xi1> to vector<8x128xi32>
    %45 = arith.sitofp %44 : vector<8x128xi32> to vector<8x128xf32>
    %46 = arith.subf %35, %29 : vector<8x128xf32>
    %47 = arith.subf %38, %32 : vector<8x128xf32>
    %48 = arith.mulf %46, %47 : vector<8x128xf32>
    %49 = arith.mulf %48, %45 : vector<8x128xf32>
    %50 = arith.addf %39, %40 : vector<8x128xf32>
    %51 = arith.subf %50, %49 : vector<8x128xf32>
    %cst_20 = arith.constant 1.000000e-16 : f32
    %52 = vector.broadcast %cst_20 : f32 to vector<8x128xf32>
    %53 = arith.addf %51, %52 : vector<8x128xf32>
    %54 = tpu.reciprocal %53 : vector<8x128xf32> -> vector<8x128xf32>
    %55 = arith.mulf %49, %54 : vector<8x128xf32>
    %56 = arith.mulf %55, %55 : vector<8x128xf32>
    %cst_21 = arith.constant 1.000000e+00 : f32
    %57 = vector.broadcast %cst_21 : f32 to vector<8x128xf32>
    %58 = arith.subf %57, %56 : vector<8x128xf32>
    %c0_22 = arith.constant 0 : index
    %c0_23 = arith.constant 0 : index
    %59 = vector.load %arg4[%c0_22, %c0_23] : memref<8x128xf32, #tpu.memory_space<vmem>>, vector<8x128xf32>
    %60 = arith.addf %59, %58 : vector<8x128xf32>
    %c0_24 = arith.constant 0 : index
    %c0_25 = arith.constant 0 : index
    %61 = vector.load %arg4[%c0_24, %c0_25] : memref<8x128xf32, #tpu.memory_space<vmem>>, vector<8x128xf32>
    tpu.vector_store %arg4[%c0_24, %c0_25], %60 {strides = array<i32>} : memref<8x128xf32, #tpu.memory_space<vmem>>, vector<8x128xf32>,
    %c0_i32_26 = arith.constant 0 : i32
    %62 = arith.cmpi eq, %arg1, %c0_i32_26 : i32
    %63 = arith.extui %62 : i1 to i32
    %c0_i32_27 = arith.constant 0 : i32
    %64 = arith.cmpi ne, %63, %c0_i32_27 : i32
    scf.if %64 {
      %c0_28 = arith.constant 0 : index
      %c0_29 = arith.constant 0 : index
      %65 = vector.load %arg4[%c0_28, %c0_29] : memref<8x128xf32, #tpu.memory_space<vmem>>, vector<8x128xf32>
      %66 = vector.shape_cast %65 : vector<8x128xf32> to vector<1x8x128xf32>
      %cst_30 = arith.constant dense<0.000000e+00> : vector<1xf32>
      %67 = vector.multi_reduction <add>, %66, %cst_30 [1, 2] : vector<1x8x128xf32> to vector<1xf32>
      %68 = vector.shape_cast %67 : vector<1xf32> to vector<1x1x1xf32>
      %69 = vector.extract %68[0, 0, 0] : f32 from vector<1x1x1xf32>
      %c0_31 = arith.constant 0 : index
      %c0_32 = arith.constant 0 : index
      %70 = memref.load %arg3[%c0_31, %c0_32] : memref<1x1xf32, #tpu.memory_space<smem>>
      memref.store %69, %arg3[%c0_31, %c0_32] : memref<1x1xf32, #tpu.memory_space<smem>>
    } else {
    }
    return
  }
  func.func @transform_0(%arg0: i32, %arg1: i32) -> (i32, i32, i32) {
    %c1_i32 = arith.constant 1 : i32
    %0 = arith.muli %arg0, %c1_i32 : i32
    %1 = arith.addi %0, %arg1 : i32
    %c0_i32 = arith.constant 0 : i32
    %c0_i32_0 = arith.constant 0 : i32
    %c0_i32_1 = arith.constant 0 : i32
    return %c0_i32, %1, %c0_i32_0 : i32, i32, i32
  }
  func.func @transform_1(%arg0: i32, %arg1: i32) -> (i32, i32) {
    %c0_i32 = arith.constant 0 : i32
    %c0_i32_0 = arith.constant 0 : i32
    return %arg0, %c0_i32 : i32, i32
  }
}

</mosaic_0001>

<bundles_post_ra>
// kernel: tpu_custom_call.1
= control target key start
LH: loop header
LB: loop body
LE: loop exit
PB: predicated region body
PF: predicated region fallthrough
CT: control target
= control target key end

     0   :  { %6 = vsyncpa [#allocation4], 0  ;;  %s198_s0 = inlined_call_operand.hbm [shape: f32[8,8,128], index: 0, kind: input, shape index: {}]   ;;  %s199_s1 = inlined_call_operand.hbm [shape: f32[1,1], index: 1, kind: output, shape index: {}]  }
   0x1   :  { %7 = vsyncpa [#allocation5], 0  ;;  %s159_s6 = smov [#allocation3]   ;;  %s123_s10 = scalar_lea.hbm %s198_s0, 1024 }
   0x2   :  { %s16_s7 = sshll.u32 %s159_s6, 4  ;;  %p124_p0 = scmp.ne.s32.totalorder %s198_s0, %s123_s10  ;;  %s17_s7 = int_to_ptr.vmem [resolvable:$true] %s16_s7 }
   0x3   :  { %p127_p1 = scmp.lt.u32.totalorder %s123_s10, %s198_s0 }
   0x5   :  { %p129_p2 = pnand %p127_p1, %p124_p0 }
   0x7   :  { %132 = shalt.err (!%p129_p2)
}
   0x8   :  { %s133_s15 = scalar_lea.vmem %s17_s7, 1024  ;;  %p138_p4 = scmp.lt.s32.totalorder %s17_s7, %s17_s7 }
   0x9   :  { %p134_p3 = scmp.ne.s32.totalorder %s17_s7, %s133_s15  ;;  %p139_p5 = scmp.lt.s32.totalorder %s133_s15, %s133_s15 }
   0xb   :  { %p140_p6 = por %p139_p5, %p138_p4 }
   0xd   :  { %p141_p7 = pnand %p140_p6, %p134_p3 }
   0xf   :  { %144 = shalt.err (!%p141_p7)
}
  0x10   :  { %s160_s16 = smov 128   ;;  %s161_s17 = smov 8  }
  0x11   :  { %22 = dma.hbm_to_vmem [thread:$0]  %s198_s0, 1024, %s17_s7, [#allocation4], %s160_s16, %s160_s16, %s161_s17  }
  0x12   :  { %155 = dma.done.wait [#allocation4], 1024  }
  0x13   :  { %156 = vsyncadd [#allocation4], 4294966272  ;;  %v32_v0 = vld [vmem:[#allocation3] sm:$0xff]  ;;  %v36_v1 = vld [vmem:[#allocation3 + $0x10] sm:$0xff]  ;;  %v162_v28 = vmov 0.0   ;;  %s145_s22 = scalar_lea.hbm %s199_s1, 16 }
  0x14   :  { %v34_v2 = vld [vmem:[#allocation3 + $0x8] sm:$0xff]  ;;  %v38_v3 = vld [vmem:[#allocation3 + $0x18] sm:$0xff]  ;;  %v40_v4 = vld [vmem:[#allocation3 + $0x20] sm:$0xff]  ;;  %v47_v5 = vmul.f32 0.5, %v36_v1  ;;  %p146_p8 = scmp.ne.s32.totalorder %s199_s1, %s145_s22  ;;  %p149_p9 = scmp.lt.u32.totalorder %s145_s22, %s199_s1 }
  0x15   :  { %v42_v6 = vld [vmem:[#allocation3 + $0x28] sm:$0xff]  ;;  %v44_v7 = vld [vmem:[#allocation3 + $0x30] sm:$0xff]  ;;  %v46_v8 = vld [vmem:[#allocation3 + $0x38] sm:$0xff]  ;;  %v48_v9 = vmul.f32 0.5, %v38_v3  ;;  %v63_v20 = vmul.f32 %v38_v3, %v36_v1 }
  0x16   :  { %v49_v10 = vmul.f32 0.5, %v44_v7  ;;  %v50_v11 = vmul.f32 0.5, %v46_v8  ;;  %v51_v12 = vsub.f32 %v32_v0, %v47_v5  ;;  %v57_v13 = vadd.f32 %v47_v5, %v32_v0  ;;  %p151_p10 = pnand %p149_p9, %p146_p8 }
  0x17   :  { %v54_v14 = vsub.f32 %v34_v2, %v48_v9  ;;  %v60_v15 = vadd.f32 %v48_v9, %v34_v2  ;;  %v64_v21 = vmul.f32 %v46_v8, %v44_v7 }
  0x18   :  { %v52_v16 = vsub.f32 %v40_v4, %v49_v10  ;;  %v55_v17 = vsub.f32 %v42_v6, %v50_v11  ;;  %v58_v18 = vadd.f32 %v49_v10, %v40_v4  ;;  %v61_v19 = vadd.f32 %v50_v11, %v42_v6 }
  0x19   :  { %v74_v31 = vadd.f32 %v64_v21, %v63_v20 }
  0x1a   :  { %v53_v22 = vmax.f32 %v51_v12, %v52_v16  ;;  %v56_v23 = vmax.f32 %v54_v14, %v55_v17  ;;  %v59_v24 = vmin.f32 %v57_v13, %v58_v18  ;;  %v62_v25 = vmin.f32 %v60_v15, %v61_v19 }
  0x1c   :  { %vm65_vm0 = vcmp.lt.f32.partialorder %v53_v22, %v59_v24  ;;  %vm66_vm1 = vcmp.lt.f32.partialorder %v56_v23, %v62_v25  ;;  %v70_v26 = vsub.f32 %v59_v24, %v53_v22  ;;  %v71_v27 = vsub.f32 %v62_v25, %v56_v23 }
  0x1d   :  { %vm67_vm2 = vmand %vm65_vm0, %vm66_vm1 }
  0x1e   :  { %v113_v29 = vsel %vm67_vm2, 1.0, %v162_v28  ;;  %v72_v30 = vmul.f32 %v71_v27, %v70_v26 }
  0x20   :  { %v73_v32 = vmul.f32 %v113_v29, %v72_v30 }
  0x22   :  { %v75_v33 = vsub.f32 %v74_v31, %v73_v32 }
  0x24   :  { %v76_v34 = vadd.f32 1e-16, %v75_v33 }
  0x26   :  { %121 = vrcp.f32 %v76_v34 }
  0x30   :  { %v122_v35 = vpop.eup %121 }
  0x31   :  { %v78_v36 = vmul.f32 %v122_v35, %v73_v32 }
  0x33   :  { %v79_v37 = vmul.f32 %v78_v36, %v78_v36 }
  0x35   :  { %v80_v38 = vsub.f32 1.0, %v79_v37 }
  0x37   :  { %88 = vadd.xlane.f32.xlu0 %v80_v38 }
  0xc4   :  { %v89_v39 = vpop.xlane.xlu0 %88 }
  0xc5   :  { %v90_v40 = vrot.slane %v89_v39, 4 }
  0xc7   :  { %v91_v41 = vadd.f32 %v90_v40, %v89_v39 }
  0xc9   :  { %v92_v42 = vrot.slane %v91_v41, 2 }
  0xcb   :  { %v93_v43 = vadd.f32 %v92_v42, %v91_v41 }
  0xcd   :  { %v94_v44 = vrot.slane %v93_v43, 1 }
  0xcf   :  { %v95_v45 = vadd.f32 %v94_v44, %v93_v43 }
  0xd1   :  { %114 = vpush %v95_v45 }
 0x102   :  { %s115_s0 = spop %114 }
 0x103   :  { %98 = sst [smem:[#allocation6]] %s115_s0 }
 0x104   :  { %154 = shalt.err (!%p151_p10)
}
 0x105   :  { %s163_s27 = smov [#allocation6]  }
 0x106   :  { %106 = dma.smem_to_hbm %s163_s27, 16, %s199_s1, [#allocation5]  }
 0x107   :  { %157 = dma.done.wait [#allocation5], 16  }
 0x108   :  { %158 = vsyncadd [#allocation5], 4294967280 }
 0x109   :  { %110 = sfence }
 0x10a   :  { %111 = vsyncpa [#allocation4], 1 }
 0x10b   :  { %112 = vsyncpa [#allocation5], 1 }

</bundles_post_ra>
